<compile_context>
chip_gen: v7x
topology: tpu7x:2x2x1
jax: 0.10.0
libtpu: 0.0.40
codegen_flags: <defaults>
</compile_context>

<pallas_src>
import functools
import math

import jax
import jax.numpy as jnp
from jax.experimental import pallas as pl
from jax.experimental.pallas import tpu as pltpu


# ----------------------------------------------------------------------------- helpers
@functools.lru_cache(maxsize=None)
def _vmem_limit_bytes():
    """Generation-aware VMEM limit: ~80% of physical, capped at 100 MiB."""
    cap = 128 * 1024 * 1024
    try:
        cap = int(pltpu.get_tpu_info().vmem_capacity_bytes)
    except Exception:
        pass
    return min(int(cap * 0.8), 100 * 1024 * 1024)


def _compiler_params(sem):
    return pltpu.CompilerParams(dimension_semantics=sem,
                                vmem_limit_bytes=_vmem_limit_bytes())


def _full(shape):
    """BlockSpec covering the whole array (single-block grid)."""
    n = len(shape)
    return pl.BlockSpec(shape, lambda i, _n=n: (0,) * _n)


def _row_tile(M, target=512):
    """Row-tile size: <= target, multiple of 8 that divides M when possible;
    if M is small the full dim (always legal); otherwise a multiple of 8 and
    the grid uses pl.cdiv (edge block handled by Pallas)."""
    if M <= target:
        return M
    t = (target // 8) * 8
    while t >= 8 and M % t:
        t -= 8
    return t if t >= 8 else (target // 8) * 8


# ----------------------------------------------------------------------------- weight-resident linear (+bias, +act)
def _linear_act_kernel(x_ref, w_ref, b_ref, o_ref, *, act):
    y = jnp.dot(x_ref[...], w_ref[...],
                preferred_element_type=jnp.float32) + b_ref[...]
    if act == "relu":
        y = jnp.maximum(y, 0.0)
    elif act == "gelu":
        # TODO(synk): HF PhoBERT uses erf-based GELU; tanh approximation kept
        # for robust Mosaic lowering (~1e-3 numerical difference).
        y = jax.nn.gelu(y, approximate=True)
    o_ref[...] = y.astype(o_ref.dtype)


def linear_act(x, w, b, act=None, out_dtype=jnp.bfloat16):
    """o = act(x @ w + b).  Full [K,N] weight resident in VMEM; only M tiled."""
    M, K = x.shape
    N = w.shape[1]
    tm = _row_tile(M)
    return pl.pallas_call(
        functools.partial(_linear_act_kernel, act=act),
        out_shape=jax.ShapeDtypeStruct((M, N), out_dtype),
        grid=(pl.cdiv(M, tm),),
        in_specs=[pl.BlockSpec((tm, K), lambda i: (i, 0)),
                  pl.BlockSpec((K, N), lambda i: (0, 0)),   # weight: streamed once
                  pl.BlockSpec((1, N), lambda i: (0, 0))],
        out_specs=pl.BlockSpec((tm, N), lambda i: (i, 0)),
        compiler_params=_compiler_params(("parallel",)),
    )(x, w, b)


# ----------------------------------------------------------------------------- weight-resident linear + bias + residual + LayerNorm
def _linear_res_ln_kernel(x_ref, w_ref, b_ref, res_ref, g_ref, beta_ref,
                          o_ref, *, eps):
    y = jnp.dot(x_ref[...], w_ref[...], preferred_element_type=jnp.float32)
    y = y + b_ref[...] + res_ref[...].astype(jnp.float32)
    mean = jnp.mean(y, axis=-1, keepdims=True)
    var = jnp.mean((y - mean) ** 2, axis=-1, keepdims=True)
    o_ref[...] = ((y - mean) * jax.lax.rsqrt(var + eps)
                  * g_ref[...] + beta_ref[...]).astype(o_ref.dtype)


def linear_res_ln(x, w, b, residual, gamma, beta, eps=1e-5):
    """o = LayerNorm(x @ w + b + residual).  Full weight resident; only M tiled."""
    M, K = x.shape
    H = w.shape[1]
    tm = _row_tile(M)
    return pl.pallas_call(
        functools.partial(_linear_res_ln_kernel, eps=eps),
        out_shape=jax.ShapeDtypeStruct((M, H), jnp.bfloat16),
        grid=(pl.cdiv(M, tm),),
        in_specs=[pl.BlockSpec((tm, K), lambda i: (i, 0)),
                  pl.BlockSpec((K, H), lambda i: (0, 0)),
                  pl.BlockSpec((1, H), lambda i: (0, 0)),
                  pl.BlockSpec((tm, H), lambda i: (i, 0)),
                  pl.BlockSpec((1, H), lambda i: (0, 0)),
                  pl.BlockSpec((1, H), lambda i: (0, 0))],
        out_specs=pl.BlockSpec((tm, H), lambda i: (i, 0)),
        compiler_params=_compiler_params(("parallel",)),
    )(x, w, b, residual, gamma, beta)


# ----------------------------------------------------------------------------- standalone LayerNorm (tiled over M)
def _layernorm_kernel(x_ref, g_ref, b_ref, o_ref, *, eps):
    x = x_ref[...].astype(jnp.float32)
    mean = jnp.mean(x, axis=-1, keepdims=True)
    var = jnp.mean((x - mean) ** 2, axis=-1, keepdims=True)
    o_ref[...] = ((x - mean) * jax.lax.rsqrt(var + eps)
                  * g_ref[...] + b_ref[...]).astype(o_ref.dtype)


def layernorm(x, g, b, eps=1e-5, out_dtype=jnp.bfloat16):
    M, H = x.shape
    tm = _row_tile(M)
    return pl.pallas_call(
        functools.partial(_layernorm_kernel, eps=eps),
        out_shape=jax.ShapeDtypeStruct((M, H), out_dtype),
        grid=(pl.cdiv(M, tm),),
        in_specs=[pl.BlockSpec((tm, H), lambda i: (i, 0)),
                  pl.BlockSpec((1, H), lambda i: (0, 0)),
                  pl.BlockSpec((1, H), lambda i: (0, 0))],
        out_specs=pl.BlockSpec((tm, H), lambda i: (i, 0)),
        compiler_params=_compiler_params(("parallel",)),
    )(x, g, b)


# ----------------------------------------------------------------------------- attention: one batch per grid step, all heads fused
def _attention_kernel(qkv_ref, bias_ref, o_ref, *, n_heads, head_dim):
    """Fused multi-head SDPA.

    qkv : [1, S, 3H] bf16 (1/sqrt(Dh) already folded into the Q projection)
    bias: [1, 1, S]  f32  (0 real tokens, -1e9 padding)
    out : [1, S, H]  bf16 (lane-dense single store)
    """
    H = n_heads * head_dim
    qkv = qkv_ref[0]                       # [S, 3H] bf16
    bias = bias_ref[0]                     # [1, S]  f32

    # Single XLU transpose of the whole K slab (instead of one implicit
    # transpose per head inside dot_general).
    kt = qkv[:, H:2 * H].T                 # [H, S] bf16

    ctx_heads = []
    for h in range(n_heads):               # unrolled: MXU pushes back-to-back
        lo = h * head_dim
        q = qkv[:, lo:lo + head_dim]                 # [S, Dh] (pre-scaled)
        k_t = kt[lo:lo + head_dim, :]                # [Dh, S]
        v = qkv[:, 2 * H + lo:2 * H + lo + head_dim]

        s = jnp.dot(q, k_t, preferred_element_type=jnp.float32) + bias
        m = jnp.max(s, axis=-1, keepdims=True)
        p = jnp.exp(s - m)
        denom = jnp.sum(p, axis=-1, keepdims=True)
        p = p * pl.reciprocal(denom, approx=True)    # EUP, frees the VALU slot
        ctx_heads.append(jnp.dot(p.astype(qkv.dtype), v,
                                 preferred_element_type=jnp.float32)
                         .astype(o_ref.dtype))

    # TODO(synk): for long sequences on v7x (64 MiB VMEM) switch to a
    # flash-style KV-tiled online softmax; whole-sequence-per-step is fine here.
    o_ref[0] = jnp.concatenate(ctx_heads, axis=-1)   # single lane-dense store


def attention(qkv, mask_bias, n_heads, head_dim):
    B, S, H3 = qkv.shape
    H = H3 // 3
    return pl.pallas_call(
        functools.partial(_attention_kernel, n_heads=n_heads, head_dim=head_dim),
        out_shape=jax.ShapeDtypeStruct((B, S, H), jnp.bfloat16),
        grid=(B,),
        in_specs=[pl.BlockSpec((1, S, H3), lambda b: (b, 0, 0)),
                  pl.BlockSpec((1, 1, S), lambda b: (b, 0, 0))],
        out_specs=pl.BlockSpec((1, S, H), lambda b: (b, 0, 0)),
        compiler_params=_compiler_params(("parallel",)),
    )(qkv, mask_bias)


# ----------------------------------------------------------------------------- fused multi-task heads (single lane-dense output slab)
def _heads_kernel(h_ref,
                  ws1, bs1, ws2, bs2,          # specialty classifier
                  wy1, by1, wy2, by2,          # symptom detector
                  wt1h, wt1s, bt1, wt2, bt2,   # treatment recommender (W1 split: [hidden; symptom])
                  o_ref, *, n_spec, n_sym, n_treat):
    h = h_ref[...]                              # [Bp, H] bf16
    f32 = jnp.float32

    # specialty_classifier: Linear -> ReLU -> (Dropout=id) -> Linear
    sh = jnp.maximum(jnp.dot(h, ws1[...], preferred_element_type=f32) + bs1[...], 0.0)
    spec = jnp.dot(sh.astype(h.dtype), ws2[...], preferred_element_type=f32) + bs2[...]

    # symptom_detector: Linear -> ReLU -> (Dropout=id) -> Linear
    yh = jnp.maximum(jnp.dot(h, wy1[...], preferred_element_type=f32) + by1[...], 0.0)
    symp = jnp.dot(yh.astype(h.dtype), wy2[...], preferred_element_type=f32) + by2[...]

    # treatment_recommender on concat([h, sigmoid(symp)]), realized algebraically:
    symp_feat = jax.nn.sigmoid(symp).astype(h.dtype)
    th = (jnp.dot(h, wt1h[...], preferred_element_type=f32)
          + jnp.dot(symp_feat, wt1s[...], preferred_element_type=f32)
          + bt1[...])
    th = jnp.maximum(th, 0.0)
    treat = jnp.dot(th.astype(h.dtype), wt2[...], preferred_element_type=f32) + bt2[...]

    total = n_spec + n_sym + n_treat
    pad = o_ref.shape[1] - total
    pieces = [spec, symp, treat]
    if pad > 0:
        pieces.append(jnp.zeros((h.shape[0], pad), f32))
    o_ref[...] = jnp.concatenate(pieces, axis=-1)   # single lane-dense store


def heads(h_cls, hp):
    B, H = h_cls.shape
    n_spec = hp["ws2"].shape[1]
    n_sym = hp["wy2"].shape[1]
    n_treat = hp["wt2"].shape[1]
    total = n_spec + n_sym + n_treat
    P = max(128, ((total + 127) // 128) * 128)   # lane-dense padded output width

    # pad the pooled rows to a sublane multiple (>= 8) to avoid masked stores
    Bp = max(8, ((B + 7) // 8) * 8)
    h_in = h_cls if Bp == B else jnp.pad(h_cls, ((0, Bp - B), (0, 0)))

    args = (h_in,
            hp["ws1"], hp["bs1"], hp["ws2"], hp["bs2"],
            hp["wy1"], hp["by1"], hp["wy2"], hp["by2"],
            hp["wt1h"], hp["wt1s"], hp["bt1"], hp["wt2"], hp["bt2"])
    slab = pl.pallas_call(
        functools.partial(_heads_kernel, n_spec=n_spec, n_sym=n_sym, n_treat=n_treat),
        out_shape=jax.ShapeDtypeStruct((Bp, P), jnp.float32),
        grid=(1,),
        in_specs=[_full(a.shape) for a in args],
        out_specs=_full((Bp, P)),
        compiler_params=_compiler_params(("arbitrary",)),
    )(*args)
    return (slab[:B, :n_spec],
            slab[:B, n_spec:n_spec + n_sym],
            slab[:B, n_spec + n_sym:total])


# ----------------------------------------------------------------------------- encoder glue
def encoder_layer(h2, p, mask_bias, n_heads, head_dim, B, S):
    H = n_heads * head_dim

    # fused QKV projection: one [H, 3H] matmul (Q columns carry the 1/sqrt(Dh) scale)
    qkv = linear_act(h2, p["w_qkv"], p["b_qkv"], act=None)                   # [B*S, 3H]
    ctx = attention(qkv.reshape(B, S, 3 * H), mask_bias, n_heads, head_dim)  # [B, S, H]
    ctx2 = ctx.reshape(B * S, H)

    # attention output projection fused with residual add + LayerNorm
    h2 = linear_res_ln(ctx2, p["wo"], p["bo"], h2, p["ln1_g"], p["ln1_b"])

    # FFN: up-projection + GELU, then down-projection fused with residual + LayerNorm
    ffn = linear_act(h2, p["w1"], p["b1"], act="gelu")
    h2 = linear_res_ln(ffn, p["w2"], p["b2"], h2, p["ln2_g"], p["ln2_b"])
    return h2


def enhanced_medical_phobert_forward(params, input_ids, attention_mask, labels=None):
    B, S = input_ids.shape
    H = params["word_emb"].shape[1]
    n_heads = params["n_heads"]
    head_dim = H // n_heads

    mask_i = attention_mask.astype(jnp.int32)
    mask_f = attention_mask.astype(jnp.float32)

    # RoBERTa/PhoBERT position ids that skip padding tokens
    # (create_position_ids_from_input_ids, padding_idx = 1).
    positions = jnp.cumsum(mask_i, axis=1) * mask_i + 1

    # embeddings (gather is XLA glue); sum + cast to bf16 before the LN kernel
    # so the mem-bound LayerNorm stage reads/writes half the HBM bytes.
    emb = (jnp.take(params["word_emb"], input_ids, axis=0)
           + jnp.take(params["pos_emb"], positions, axis=0)
           + params["type_emb"][None, :, :]).astype(jnp.bfloat16)
    h2 = layernorm(emb.reshape(B * S, H), params["emb_ln_g"], params["emb_ln_b"])

    # additive attention-mask bias kept in f32: 0 for real tokens, -1e9 for padding
    mask_bias = ((1.0 - mask_f) * -1e9).reshape(B, 1, S)

    for layer_p in params["layers"]:
        h2 = encoder_layer(h2, layer_p, mask_bias, n_heads, head_dim, B, S)

    # CLS pooling + dropout (identity in eval mode)
    sequence_output = h2.reshape(B, S, H)[:, 0, :]     # [B, H] bf16

    specialty_logits, symptom_logits, treatment_logits = heads(sequence_output,
                                                               params["heads"])
    result = {
        "specialty_logits": specialty_logits,
        "symptom_logits": symptom_logits,
        "treatment_logits": treatment_logits,
    }

    if labels is not None:
        # CrossEntropyLoss over rows with label != -100 (plain JAX glue)
        valid = labels != -100
        safe_labels = jnp.where(valid, labels, 0)
        logp = jax.nn.log_softmax(specialty_logits, axis=-1)
        nll = -jnp.take_along_axis(logp, safe_labels[:, None], axis=-1)[:, 0]
        denom = jnp.maximum(jnp.sum(valid.astype(jnp.float32)), 1.0)
        result["specialty_loss"] = jnp.sum(jnp.where(valid, nll, 0.0)) / denom
    return result


# ----------------------------------------------------------------------------- deterministic init
def init_params(key, *, vocab, max_pos, H, n_heads, n_layers, ffn,
                n_specialties, n_symptoms, n_treatments):
    keys = iter(jax.random.split(key, 256))
    head_dim = H // n_heads
    q_scale = 1.0 / math.sqrt(head_dim)

    def dense(fan_in, fan_out, scale=0.02):
        # weights stored in bf16 (MXU-native); biases / LN params stay f32
        return (scale * jax.random.normal(next(keys), (fan_in, fan_out),
                                          jnp.float32)).astype(jnp.bfloat16)

    def bias(n):
        return jnp.zeros((1, n), jnp.float32)

    params = {
        "n_heads": n_heads,
        "word_emb": 0.02 * jax.random.normal(next(keys), (vocab, H), jnp.float32),
        "pos_emb": 0.02 * jax.random.normal(next(keys), (max_pos, H), jnp.float32),
        "type_emb": 0.02 * jax.random.normal(next(keys), (1, H), jnp.float32),
        "emb_ln_g": jnp.ones((1, H), jnp.float32),
        "emb_ln_b": jnp.zeros((1, H), jnp.float32),
        "layers": [],
    }
    for _ in range(n_layers):
        wq, wk, wv = dense(H, H), dense(H, H), dense(H, H)
        bq, bk, bv = bias(H), bias(H), bias(H)
        # Fold the 1/sqrt(head_dim) attention scale into the Q projection
        # (zero in-kernel cost; do the same when importing real PhoBERT weights).
        wq = (wq.astype(jnp.float32) * q_scale).astype(jnp.bfloat16)
        bq = bq * q_scale
        params["layers"].append({
            "w_qkv": jnp.concatenate([wq, wk, wv], axis=1),
            "b_qkv": jnp.concatenate([bq, bk, bv], axis=1),
            "wo": dense(H, H), "bo": bias(H),
            "ln1_g": jnp.ones((1, H), jnp.float32), "ln1_b": jnp.zeros((1, H), jnp.float32),
            "w1": dense(H, ffn), "b1": bias(ffn),
            "w2": dense(ffn, H), "b2": bias(H),
            "ln2_g": jnp.ones((1, H), jnp.float32), "ln2_b": jnp.zeros((1, H), jnp.float32),
        })
    params["heads"] = {
        # specialty_classifier: Linear(H,H) -> ReLU -> Dropout -> Linear(H, n_specialties)
        "ws1": dense(H, H), "bs1": bias(H),
        "ws2": dense(H, n_specialties), "bs2": bias(n_specialties),
        # symptom_detector: Linear(H,H) -> ReLU -> Dropout -> Linear(H, n_symptoms)
        "wy1": dense(H, H), "by1": bias(H),
        "wy2": dense(H, n_symptoms), "by2": bias(n_symptoms),
        # treatment_recommender: Linear(H + n_symptoms, H) -> ReLU -> Dropout -> Linear(H, n_treatments)
        "wt1h": dense(H, H), "wt1s": dense(n_symptoms, H), "bt1": bias(H),
        "wt2": dense(H, n_treatments), "bt2": bias(n_treatments),
    }
    return params


# ----------------------------------------------------------------------------- demo
if __name__ == "__main__":
    B, S = 2, 16
    H, N_HEADS, N_LAYERS, FFN = 128, 4, 2, 256
    N_SPEC, N_SYM, N_TREAT = 8, 16, 8
    VOCAB, MAX_POS = 1000, 64

    root = jax.random.PRNGKey(0)
    k_params, k_ids = jax.random.split(root)

    params = init_params(k_params, vocab=VOCAB, max_pos=MAX_POS, H=H, n_heads=N_HEADS,
                         n_layers=N_LAYERS, ffn=FFN,
                         n_specialties=N_SPEC, n_symptoms=N_SYM, n_treatments=N_TREAT)

    input_ids = jax.random.randint(k_ids, (B, S), 0, VOCAB, dtype=jnp.int32)
    attention_mask = jnp.ones((B, S), dtype=jnp.int32).at[1, S - 4:].set(0)

    # TODO(synk): pretrained PhoBERT weights / tokenizer are not loadable here; encoder
    # uses deterministic synthetic parameters with identical forward structure.
    out = enhanced_medical_phobert_forward(params, input_ids, attention_mask, labels=None)
    jax.block_until_ready(out)

    assert out["specialty_logits"].shape == (B, N_SPEC)
    assert out["symptom_logits"].shape == (B, N_SYM)
    assert out["treatment_logits"].shape == (B, N_TREAT)
    assert bool(jnp.all(jnp.isfinite(out["specialty_logits"])))
    print("KERNEL_OK")
</pallas_src>

<mosaic_0001>
module attributes {stable_mosaic.version = 11 : i64} {
  func.func @_layernorm_kernel(%arg0: i32, %arg1: memref<32x128xbf16, #tpu.memory_space<vmem>>, %arg2: memref<1x128xf32, #tpu.memory_space<vmem>>, %arg3: memref<1x128xf32, #tpu.memory_space<vmem>>, %arg4: memref<32x128xbf16, #tpu.memory_space<vmem>>) attributes {dimension_semantics = [#tpu.dimension_semantics<parallel>], iteration_bounds = array<i64: 1>, scalar_prefetch = 0 : i64, scratch_operands = 0 : i64, tpu.core_type = #tpu.core_type<tc>, window_params = [{transform_indices = @transform_0, window_bounds = array<i64: 32, 128>}, {pipeline_mode = #tpu.pipeline_mode<synchronous>, transform_indices = @transform_1, window_bounds = array<i64: 1, 128>}, {pipeline_mode = #tpu.pipeline_mode<synchronous>, transform_indices = @transform_2, window_bounds = array<i64: 1, 128>}, {transform_indices = @transform_3, window_bounds = array<i64: 32, 128>}]} {
    %c0 = arith.constant 0 : index
    %c0_0 = arith.constant 0 : index
    %0 = vector.load %arg1[%c0, %c0_0] : memref<32x128xbf16, #tpu.memory_space<vmem>>, vector<32x128xbf16>
    %1 = arith.extf %0 : vector<32x128xbf16> to vector<32x128xf32>
    %cst = arith.constant dense<0.000000e+00> : vector<32xf32>
    %2 = vector.multi_reduction <add>, %1, %cst [1] : vector<32x128xf32> to vector<32xf32>
    %3 = vector.shape_cast %2 : vector<32xf32> to vector<32x1xf32>
    %cst_1 = arith.constant 1.280000e+02 : f32
    %4 = vector.broadcast %cst_1 : f32 to vector<32x1xf32>
    %5 = arith.divf %3, %4 : vector<32x1xf32>
    %6 = vector.broadcast %5 : vector<32x1xf32> to vector<32x128xf32>
    %7 = arith.subf %1, %6 : vector<32x128xf32>
    %8 = arith.mulf %7, %7 : vector<32x128xf32>
    %cst_2 = arith.constant dense<0.000000e+00> : vector<32xf32>
    %9 = vector.multi_reduction <add>, %8, %cst_2 [1] : vector<32x128xf32> to vector<32xf32>
    %10 = vector.shape_cast %9 : vector<32xf32> to vector<32x1xf32>
    %cst_3 = arith.constant 1.280000e+02 : f32
    %11 = vector.broadcast %cst_3 : f32 to vector<32x1xf32>
    %12 = arith.divf %10, %11 : vector<32x1xf32>
    %13 = vector.broadcast %5 : vector<32x1xf32> to vector<32x128xf32>
    %14 = arith.subf %1, %13 : vector<32x128xf32>
    %cst_4 = arith.constant 9.99999974E-6 : f32
    %15 = vector.broadcast %cst_4 : f32 to vector<32x1xf32>
    %16 = arith.addf %12, %15 : vector<32x1xf32>
    %17 = math.rsqrt %16 : vector<32x1xf32>
    %18 = vector.broadcast %17 : vector<32x1xf32> to vector<32x128xf32>
    %19 = arith.mulf %14, %18 : vector<32x128xf32>
    %c0_5 = arith.constant 0 : index
    %c0_6 = arith.constant 0 : index
    %20 = vector.load %arg2[%c0_5, %c0_6] : memref<1x128xf32, #tpu.memory_space<vmem>>, vector<1x128xf32>
    %21 = vector.broadcast %20 : vector<1x128xf32> to vector<32x128xf32>
    %22 = arith.mulf %19, %21 : vector<32x128xf32>
    %c0_7 = arith.constant 0 : index
    %c0_8 = arith.constant 0 : index
    %23 = vector.load %arg3[%c0_7, %c0_8] : memref<1x128xf32, #tpu.memory_space<vmem>>, vector<1x128xf32>
    %24 = vector.broadcast %23 : vector<1x128xf32> to vector<32x128xf32>
    %25 = arith.addf %22, %24 : vector<32x128xf32>
    %26 = arith.truncf %25 : vector<32x128xf32> to vector<32x128xbf16>
    %c0_9 = arith.constant 0 : index
    %c0_10 = arith.constant 0 : index
    %27 = vector.load %arg4[%c0_9, %c0_10] : memref<32x128xbf16, #tpu.memory_space<vmem>>, vector<32x128xbf16>
    tpu.vector_store %arg4[%c0_9, %c0_10], %26 {strides = array<i32>} : memref<32x128xbf16, #tpu.memory_space<vmem>>, vector<32x128xbf16>,
    return
  }
  func.func @transform_0(%arg0: i32) -> (i32, i32) {
    %c0_i32 = arith.constant 0 : i32
    %c0_i32_0 = arith.constant 0 : i32
    return %arg0, %c0_i32 : i32, i32
  }
  func.func @transform_1(%arg0: i32) -> (i32, i32) {
    %c0_i32 = arith.constant 0 : i32
    %c0_i32_0 = arith.constant 0 : i32
    %c0_i32_1 = arith.constant 0 : i32
    return %c0_i32, %c0_i32_0 : i32, i32
  }
  func.func @transform_2(%arg0: i32) -> (i32, i32) {
    %c0_i32 = arith.constant 0 : i32
    %c0_i32_0 = arith.constant 0 : i32
    %c0_i32_1 = arith.constant 0 : i32
    return %c0_i32, %c0_i32_0 : i32, i32
  }
  func.func @transform_3(%arg0: i32) -> (i32, i32) {
    %c0_i32 = arith.constant 0 : i32
    %c0_i32_0 = arith.constant 0 : i32
    return %arg0, %c0_i32 : i32, i32
  }
}

</mosaic_0001>

<bundles_post_ra>
// kernel: tpu_custom_call.1
= control target key start
LH: loop header
LB: loop body
LE: loop exit
PB: predicated region body
PF: predicated region fallthrough
CT: control target
= control target key end

     0   :  { %8 = vsyncpa [#allocation3], 0  ;;  %s390_s0 = inlined_call_operand.hbm [shape: bf16[32,128], index: 0, kind: input, shape index: {}]   ;;  %s391_s1 = inlined_call_operand.hbm [shape: f32[1,128], index: 1, kind: input, shape index: {}]   ;;  %s392_s2 = inlined_call_operand.hbm [shape: f32[1,128], index: 2, kind: input, shape index: {}]   ;;  %s393_s3 = inlined_call_operand.hbm [shape: bf16[32,128], index: 3, kind: output, shape index: {}]  }
   0x1   :  { %9 = vsyncpa [#allocation6], 0 }
   0x2   :  { %10 = vsyncpa [#allocation4], 0  ;;  %s303_s12 = smov [#allocation5]   ;;  %s304_s14 = smov [#allocation2]  }
   0x3   :  { %s29_s13 = sshll.u32 %s303_s12, 4  ;;  %s16_s15 = sshll.u32 %s304_s14, 4  ;;  %s30_s13 = int_to_ptr.vmem [resolvable:$true] %s29_s13  ;;  %s329_s15 = int_to_ptr.vmem [resolvable:$true] %s16_s15 }
   0x4   :  { %s209_s18 = scalar_lea.hbm %s391_s1, 16 }
   0x5   :  { %p210_p0 = scmp.ne.s32.totalorder %s391_s1, %s209_s18  ;;  %p213_p1 = scmp.lt.u32.totalorder %s209_s18, %s391_s1 }
   0x7   :  { %p215_p2 = pnand %p213_p1, %p210_p0 }
   0x9   :  { %218 = shalt.err (!%p215_p2)
}
   0xa   :  { %s219_s23 = scalar_lea.vmem %s30_s13, 16  ;;  %s223_s24 = scalar_lea.vmem %s30_s13, 32 }
   0xb   :  { %p220_p3 = scmp.ne.s32.totalorder %s30_s13, %s219_s23  ;;  %p224_p4 = scmp.lt.s32.totalorder %s30_s13, %s30_s13 }
   0xc   :  { %p225_p5 = scmp.lt.s32.totalorder %s223_s24, %s219_s23 }
   0xe   :  { %p226_p6 = por %p225_p5, %p224_p4 }
  0x10   :  { %p227_p7 = pnand %p226_p6, %p220_p3 }
  0x12   :  { %230 = shalt.err (!%p227_p7)
}
  0x13   :  { %32 = dma.hbm_to_vmem [thread:$0]  %s391_s1, 16, %s30_s13, [#allocation6]  }
  0x14   :  { %s231_s29 = scalar_lea.hbm %s390_s0, 256 }
  0x15   :  { %p232_p8 = scmp.ne.s32.totalorder %s390_s0, %s231_s29  ;;  %p235_p9 = scmp.lt.u32.totalorder %s231_s29, %s390_s0 }
  0x17   :  { %p237_p10 = pnand %p235_p9, %p232_p8 }
  0x19   :  { %240 = shalt.err (!%p237_p10)
}
  0x1a   :  { %s241_s7 = scalar_lea.vmem %s329_s15, 256  ;;  %p246_p12 = scmp.lt.s32.totalorder %s329_s15, %s329_s15 }
  0x1b   :  { %p242_p11 = scmp.ne.s32.totalorder %s329_s15, %s241_s7  ;;  %p247_p13 = scmp.lt.s32.totalorder %s241_s7, %s241_s7 }
  0x1d   :  { %p248_p0 = por %p247_p13, %p246_p12 }
  0x1f   :  { %p249_p1 = pnand %p248_p0, %p242_p11 }
  0x21   :  { %252 = shalt.err (!%p249_p1)
}
  0x22   :  { %s305_s1 = smov 64   ;;  %s306_s8 = smov 4  }
  0x23   :  { %22 = dma.hbm_to_vmem [thread:$0]  %s390_s0, 256, %s329_s15, [#allocation3], %s305_s1, %s305_s1, %s306_s8  }
  0x24   :  { %s307_s11 = smov [#allocation7]   ;;  %s253_s16 = scalar_lea.hbm %s392_s2, 16 }
  0x25   :  { %s39_s12 = sshll.u32 %s307_s11, 4  ;;  %p254_p2 = scmp.ne.s32.totalorder %s392_s2, %s253_s16  ;;  %s40_s12 = int_to_ptr.vmem [resolvable:$true] %s39_s12 }
  0x26   :  { %p257_p3 = scmp.lt.u32.totalorder %s253_s16, %s392_s2 }
  0x28   :  { %p259_p4 = pnand %p257_p3, %p254_p2 }
  0x2a   :  { %262 = shalt.err (!%p259_p4)
}
  0x2b   :  { %s263_s21 = scalar_lea.vmem %s40_s12, 16  ;;  %s267_s0 = scalar_lea.vmem %s40_s12, 32 }
  0x2c   :  { %p264_p5 = scmp.ne.s32.totalorder %s40_s12, %s263_s21  ;;  %p268_p6 = scmp.lt.s32.totalorder %s40_s12, %s40_s12 }
  0x2d   :  { %p269_p7 = scmp.lt.s32.totalorder %s267_s0, %s263_s21 }
  0x2f   :  { %p270_p8 = por %p269_p7, %p268_p6 }
  0x31   :  { %p271_p9 = pnand %p270_p8, %p264_p5 }
  0x33   :  { %274 = shalt.err (!%p271_p9)
}
  0x34   :  { %42 = dma.hbm_to_vmem [thread:$0]  %s392_s2, 16, %s40_s12, [#allocation6]  }
  0x35   :  { %297 = dma.done.wait [#allocation3], 256  }
  0x36   :  { %298 = vsyncadd [#allocation3], 4294967040 }
  0x37   :  { %299 = dma.done.wait [#allocation6], 32  }
  0x38   :  { %300 = vsyncadd [#allocation6], 4294967264  ;;  %v176_v0 = vld [vmem:[#allocation2] sm:$0xff]   ;;  %v193_v1 = vld [vmem:[#allocation2 + $0x8] sm:$0xff]   ;;  %s308_s2 = smov [#allocation8]  }
  0x39   :  { %v177_v2 = vunpack.c.l.bf16 %v176_v0  ;;  %v181_v3 = vunpack.c.l.bf16 %v193_v1  ;;  %v178_v4 = vunpack.c.h.bf16 %v176_v0  ;;  %v182_v5 = vunpack.c.h.bf16 %v193_v1  ;;  %v165_v36 = vld [vmem:[#allocation5] ss:$0 sm:$0xff]  ;;  %v166_v42 = vld [vmem:[#allocation7] ss:$0 sm:$0xff]  ;;  %s152_s23 = sshll.u32 %s308_s2, 4  ;;  %s153_s23 = int_to_ptr.vmem [resolvable:$true] %s152_s23 }
  0x3a   :  { %s275_s24 = scalar_lea.vmem %s153_s23, 256  ;;  %p280_p11 = scmp.lt.s32.totalorder %s153_s23, %s153_s23 }
  0x3b   :  { %60 = vadd.xlane.f32.xlu0 %v177_v2  ;;  %64 = vadd.xlane.f32.xlu1 %v181_v3  ;;  %p276_p10 = scmp.ne.s32.totalorder %s153_s23, %s275_s24  ;;  %p281_p12 = scmp.lt.s32.totalorder %s275_s24, %s275_s24 }
  0x3d   :  { %p282_p13 = por %p281_p12, %p280_p11 }
  0x3f   :  { %62 = vadd.xlane.f32.xlu0 %v178_v4  ;;  %66 = vadd.xlane.f32.xlu1 %v182_v5  ;;  %p283_p0 = pnand %p282_p13, %p276_p10 }
  0xc8   :  { %v61_v6 = vpop.xlane.xlu0 %60  ;;  %v65_v7 = vpop.xlane.xlu1 %64 }
  0xc9   :  { %v69_v8 = vmul.f32 0.0078125, %v61_v6  ;;  %v71_v9 = vmul.f32 0.0078125, %v65_v7 }
  0xcb   :  { %v73_v10 = vsub.f32 %v177_v2, %v69_v8  ;;  %v75_v11 = vsub.f32 %v181_v3, %v71_v9 }
  0xcc   :  { %v63_v12 = vpop.xlane.xlu0 %62  ;;  %v67_v13 = vpop.xlane.xlu1 %66 }
  0xcd   :  { %v70_v14 = vmul.f32 0.0078125, %v63_v12  ;;  %v77_v15 = vmul.f32 %v73_v10, %v73_v10  ;;  %v72_v16 = vmul.f32 0.0078125, %v67_v13  ;;  %v79_v19 = vmul.f32 %v75_v11, %v75_v11 }
  0xcf   :  { %v74_v17 = vsub.f32 %v178_v4, %v70_v14  ;;  %81 = vadd.xlane.f32.xlu0 %v77_v15  ;;  %v76_v18 = vsub.f32 %v182_v5, %v72_v16 }
  0xd1   :  { %v78_v20 = vmul.f32 %v74_v17, %v74_v17  ;;  %v80_v21 = vmul.f32 %v76_v18, %v76_v18 }
  0xd3   :  { %85 = vadd.xlane.f32.xlu0 %v79_v19  ;;  %83 = vadd.xlane.f32.xlu1 %v78_v20 }
  0xd7   :  { %87 = vadd.xlane.f32.xlu1 %v80_v21 }
 0x15c   :  { %v82_v22 = vpop.xlane.xlu0 %81 }
 0x15d   :  { %v89_v23 = vmul.f32 0.0078125, %v82_v22 }
 0x15f   :  { %v93_v24 = vadd.f32 1e-05, %v89_v23 }
 0x160   :  { %v84_v25 = vpop.xlane.xlu1 %83  ;;  %v86_v26 = vpop.xlane.xlu0 %85 }
 0x161   :  { %201 = vrsqrt.f32 %v93_v24  ;;  %v90_v27 = vmul.f32 0.0078125, %v84_v25  ;;  %v91_v28 = vmul.f32 0.0078125, %v86_v26 }
 0x163   :  { %v94_v29 = vadd.f32 1e-05, %v90_v27  ;;  %v95_v30 = vadd.f32 1e-05, %v91_v28 }
 0x164   :  { %v88_v31 = vpop.xlane.xlu1 %87 }
 0x165   :  { %203 = vrsqrt.f32 %v94_v29  ;;  %v92_v32 = vmul.f32 0.0078125, %v88_v31 }
 0x166   :  { %205 = vrsqrt.f32 %v95_v30 }
 0x167   :  { %v96_v33 = vadd.f32 1e-05, %v92_v32 }
 0x169   :  { %207 = vrsqrt.f32 %v96_v33 }
 0x16b   :  { %v202_v34 = vpop.eup %201 }
 0x16c   :  { %v101_v35 = vmul.f32 %v202_v34, %v73_v10 }
 0x16e   :  { %v112_v40 = vmul.f32 %v165_v36, %v101_v35 }
 0x16f   :  { %v204_v37 = vpop.eup %203 }
 0x170   :  { %v206_v38 = vpop.eup %205  ;;  %v102_v39 = vmul.f32 %v204_v37, %v74_v17  ;;  %v123_v47 = vadd.f32 %v166_v42, %v112_v40 }
 0x171   :  { %v103_v41 = vmul.f32 %v206_v38, %v75_v11 }
 0x172   :  { %v113_v43 = vmul.f32 %v165_v36, %v102_v39 }
 0x173   :  { %v208_v44 = vpop.eup %207  ;;  %v114_v46 = vmul.f32 %v165_v36, %v103_v41 }
 0x174   :  { %v104_v45 = vmul.f32 %v208_v44, %v76_v18  ;;  %v124_v48 = vadd.f32 %v166_v42, %v113_v43 }
 0x175   :  { %v125_v51 = vadd.f32 %v166_v42, %v114_v46 }
 0x176   :  { %v115_v49 = vmul.f32 %v165_v36, %v104_v45  ;;  %v186_v50 = vpack.c.bf16 %v124_v48, %v123_v47 }
 0x178   :  { %v126_v52 = vadd.f32 %v166_v42, %v115_v49  ;;  %187 = vst [vmem:[#allocation8] sm:$0xff] %v186_v50  }
 0x17a   :  { %v191_v53 = vpack.c.bf16 %v126_v52, %v125_v51 }
 0x17c   :  { %194 = vst [vmem:[#allocation8 + $0x8] sm:$0xff] %v191_v53  }
 0x17d   :  { %286 = shalt.err (!%p283_p0)
}
 0x17e   :  { %s287_s27 = scalar_lea.hbm %s393_s3, 256 }
 0x17f   :  { %p288_p1 = scmp.ne.s32.totalorder %s393_s3, %s287_s27  ;;  %p291_p2 = scmp.lt.u32.totalorder %s287_s27, %s393_s3 }
 0x181   :  { %p293_p3 = pnand %p291_p2, %p288_p1 }
 0x183   :  { %296 = shalt.err (!%p293_p3)
}
 0x184   :  { %158 = dma.vmem_to_hbm [thread:$0]  %s153_s23, 256, %s393_s3, [#allocation4], %s305_s1, %s305_s1, %s306_s8  }
 0x185   :  { %301 = dma.done.wait [#allocation4], 256  }
 0x186   :  { %302 = vsyncadd [#allocation4], 4294967040 }
 0x187   :  { %162 = vsyncpa [#allocation3], 1 }
 0x188   :  { %163 = vsyncpa [#allocation6], 1 }
 0x189   :  { %164 = vsyncpa [#allocation4], 1 }

</bundles_post_ra>
